<compile_context>
chip_gen: v5e
topology: v5e:2x2
jax: 0.10.0
libtpu: 0.0.40
codegen_flags: <defaults>
</compile_context>

<pallas_src>
import functools

import jax
import jax.numpy as jnp
from jax.experimental import pallas as pl
from jax.experimental.pallas import tpu as pltpu

_NEG_BIG = -1e30  # class-padding value; exp(_NEG_BIG - m) == 0, never the row max


def _round_up(x, m):
    return (x + m - 1) // m * m


def _focal_loss_kernel(logits_ref, targets_ref, out_ref, m_ref, s_ref, t_ref, *, gamma):
    """Grid = (batch_tiles, class_tiles); class axis is an online-logsumexp reduction."""
    k = pl.program_id(1)

    @pl.when(k == 0)
    def _init():
        m_ref[...] = jnp.full_like(m_ref, _NEG_BIG)   # running row max
        s_ref[...] = jnp.zeros_like(s_ref)            # running sum(exp(x - m))
        t_ref[...] = jnp.zeros_like(t_ref)            # logit at the target class

    x = logits_ref[...].astype(jnp.float32)           # (TB, TC)
    tgt = targets_ref[...]                             # (TB, 1) int32
    TB, TC = x.shape

    # One-hot(target) restricted to this class tile via a lane-iota compare.
    col = jax.lax.broadcasted_iota(jnp.int32, (TB, TC), 1) + k * TC
    onehot = col == tgt                                 # (TB, TC) bool

    # Exactly one class tile contributes the target logit per row.
    t_ref[...] += jnp.sum(jnp.where(onehot, x, 0.0), axis=1, keepdims=True)

    # Online logsumexp update.
    m_old = m_ref[...]
    m_new = jnp.maximum(m_old, jnp.max(x, axis=1, keepdims=True))
    s_ref[...] = (s_ref[...] * jnp.exp(m_old - m_new)
                  + jnp.sum(jnp.exp(x - m_new), axis=1, keepdims=True))
    m_ref[...] = m_new

    @pl.when(k == pl.num_programs(1) - 1)
    def _finalize():
        # ce = -log_softmax(x)[target] = (m + log(sum_e)) - x[target]
        ce = (m_ref[...] - t_ref[...]) + jnp.log(s_ref[...])
        pt = jnp.exp(-ce)                               # = p[target]
        one_minus_pt = 1.0 - pt
        g = gamma
        if g == int(g) and 0 <= int(g) <= 8:
            focal = jnp.ones_like(one_minus_pt)
            for _ in range(int(g)):                     # gamma=2 -> x*x, no pow
                focal = focal * one_minus_pt
        else:
            focal = one_minus_pt ** g
        out_ref[...] = focal * ce                       # (TB, 1) per-sample loss


def _choose_tiles(B, C, itemsize, tb_override=None, tc_override=None):
    """Pick (TB, TC, vmem_limit) so blocks sit near the ~2 MiB DMA sweet spot and
    the double-buffered inputs stay inside a per-generation VMEM budget."""
    b8 = _round_up(B, 8)

    try:  # per-generation VMEM (v5e/v6e: 128 MiB, v7x: 64 MiB per TC)
        vmem_cap = int(pltpu.get_tpu_info().vmem_capacity_bytes)
    except Exception:
        vmem_cap = 64 << 20  # conservative: assume v7x
    vmem_limit = min(40 << 20, (vmem_cap * 3) // 5)   # leave Mosaic headroom
    max_block_bytes = vmem_limit // 4                 # 2x double-buffered <= half limit
    target_block_bytes = 2 << 20                      # ~85% of HBM roofline per docs

    if tb_override is not None:
        TB = int(tb_override)
    elif b8 <= 128:
        TB = b8                                       # tiny batch: one whole tile
    else:
        rows = max(128, (target_block_bytes // max(C * itemsize, 1)) // 128 * 128)
        TB = min(rows, 4096, _round_up(B, 128))
        # Prefer >= 2 batch tiles so the "parallel" axis can feed both v7x cores.
        if _round_up(B, TB) // TB < 2 and TB > 128:
            TB = max(128, (TB // 2) // 128 * 128)

    if tc_override is not None:
        TC = int(tc_override)
    elif TB * C * itemsize <= max_block_bytes:
        TC = C                                        # whole class dim in one block
    else:
        TC = max(128, (max_block_bytes // (TB * itemsize)) // 128 * 128)
        TC = min(TC, _round_up(C, 128))

    return TB, TC, int(vmem_limit)


def focal_loss(logits, targets, alpha=None, gamma=2.0, reduction="mean",
               _tb_override=None, _tc_override=None):
    """Pallas TPU implementation of FocalLoss.forward.

    logits:  (B, C) float (bf16 inputs are DMA'd as bf16 and cast in-kernel —
             do not pre-cast to f32, it doubles HBM traffic on this mem-bound op)
    targets: (B,) integer class indices
    alpha:   optional (C,) per-class weights (list or array); None => 1.0
    """
    B, C = logits.shape
    reduction = reduction.lower()
    itemsize = logits.dtype.itemsize

    TB, TC, vmem_limit = _choose_tiles(B, C, itemsize, _tb_override, _tc_override)
    B_pad = _round_up(B, TB)
    C_pad = _round_up(C, TC)
    num_b = B_pad // TB
    num_c = C_pad // TC

    x = logits
    if C_pad != C:   # class padding must never win the max / contribute to sum-exp
        x = jnp.pad(x, ((0, 0), (0, C_pad - C)), constant_values=_NEG_BIG)
    if B_pad != B:   # padded rows produce finite garbage; sliced off below
        x = jnp.pad(x, ((0, B_pad - B), (0, 0)))

    tgt32 = targets.astype(jnp.int32)
    tgt_pad = jnp.pad(tgt32, (0, B_pad - B)) if B_pad != B else tgt32
    tgt_2d = tgt_pad.reshape(B_pad, 1)

    kernel = functools.partial(_focal_loss_kernel, gamma=float(gamma))

    cost = pl.CostEstimate(
        flops=6 * B_pad * C_pad,
        transcendentals=B_pad * C_pad + 4 * B_pad,
        bytes_accessed=B_pad * C_pad * itemsize + 2 * B_pad * 4,
    )

    out = pl.pallas_call(
        kernel,
        out_shape=jax.ShapeDtypeStruct((B_pad, 1), jnp.float32),
        grid=(num_b, num_c),
        in_specs=[
            pl.BlockSpec((TB, TC), lambda i, k: (i, k)),   # logits tile (pipelined)
            pl.BlockSpec((TB, 1), lambda i, k: (i, 0)),    # target indices (resident over k)
        ],
        out_specs=pl.BlockSpec((TB, 1), lambda i, k: (i, 0)),  # accumulator-style output
        scratch_shapes=[
            pltpu.VMEM((TB, 1), jnp.float32),   # running max
            pltpu.VMEM((TB, 1), jnp.float32),   # running sum(exp)
            pltpu.VMEM((TB, 1), jnp.float32),   # target logit
        ],
        compiler_params=pltpu.CompilerParams(
            dimension_semantics=("parallel", "arbitrary"),
            vmem_limit_bytes=vmem_limit,
        ),
        cost_estimate=cost,
    )(x, tgt_2d)

    per_sample = out[:B, 0]
    if alpha is not None:
        # Trivial B-element gather wrapper-side instead of a (TB, C) in-kernel select+reduce.
        per_sample = per_sample * jnp.asarray(alpha, jnp.float32)[tgt32]

    if reduction == "mean":
        return jnp.mean(per_sample)
    elif reduction == "sum":
        return jnp.sum(per_sample)
    else:  # 'none'
        return per_sample


def _reference_focal_loss(logits, targets, alpha, gamma, reduction):
    # Pure-JAX reference mirroring the PyTorch forward.
    log_p = jax.nn.log_softmax(logits.astype(jnp.float32), axis=1)
    p = jnp.exp(log_p)
    C = logits.shape[1]
    onehot = jax.nn.one_hot(targets, C, dtype=jnp.float32)
    ce = -jnp.sum(onehot * log_p, axis=1)
    pt = jnp.sum(onehot * p, axis=1)
    alpha_t = 1.0 if alpha is None else jnp.asarray(alpha, jnp.float32)[targets]
    loss = alpha_t * (1.0 - pt) ** gamma * ce
    if reduction == "mean":
        return loss.mean()
    elif reduction == "sum":
        return loss.sum()
    return loss


if __name__ == "__main__":
    key = jax.random.PRNGKey(0)
    k1, k2, k3, k4 = jax.random.split(key, 4)

    # Primary small case: batch=8, classes=32, per-class alpha, gamma=2.
    B, C = 8, 32
    logits = jax.random.normal(k1, (B, C), dtype=jnp.float32)
    targets = jax.random.randint(k2, (B,), 0, C, dtype=jnp.int32)
    alpha = (jnp.arange(C, dtype=jnp.float32) + 1.0) / C
    gamma = 2.0

    for red in ("mean", "sum", "none"):
        out = jax.block_until_ready(
            focal_loss(logits, targets, alpha=alpha, gamma=gamma, reduction=red))
        ref = _reference_focal_loss(logits, targets, alpha, gamma, red)
        assert jnp.allclose(out, ref, atol=1e-5, rtol=1e-5), (red, out, ref)

    # Multi-tile path: 3 batch tiles + 2 class tiles (online logsumexp), padding on
    # both axes, alpha=None.
    B2, C2 = 300, 200
    logits2 = jax.random.normal(k3, (B2, C2), dtype=jnp.float32)
    targets2 = jax.random.randint(k4, (B2,), 0, C2, dtype=jnp.int32)
    out2 = jax.block_until_ready(
        focal_loss(logits2, targets2, alpha=None, gamma=gamma, reduction="mean",
                   _tb_override=128, _tc_override=128))
    ref2 = _reference_focal_loss(logits2, targets2, None, gamma, "mean")
    assert jnp.allclose(out2, ref2, atol=1e-4, rtol=1e-4), (out2, ref2)

    # TODO(synk): dense / soft-label targets (targets.dim()==2) path is not wired
    # into the kernel; only integer class-index targets are supported here.

    print("KERNEL_OK")
</pallas_src>

<mosaic_0001>
module attributes {stable_mosaic.version = 11 : i64} {
  func.func @_focal_loss_kernel(%arg0: i32, %arg1: i32, %arg2: memref<8x32xf32, #tpu.memory_space<vmem>>, %arg3: memref<8x1xi32, #tpu.memory_space<vmem>>, %arg4: memref<8x1xf32, #tpu.memory_space<vmem>>, %arg5: memref<8x1xf32, #tpu.memory_space<vmem>>, %arg6: memref<8x1xf32, #tpu.memory_space<vmem>>, %arg7: memref<8x1xf32, #tpu.memory_space<vmem>>) attributes {dimension_semantics = [#tpu.dimension_semantics<parallel>, #tpu.dimension_semantics<arbitrary>], iteration_bounds = array<i64: 1, 1>, scalar_prefetch = 0 : i64, scratch_operands = 3 : i64, tpu.core_type = #tpu.core_type<tc>, window_params = [{transform_indices = @transform_0, window_bounds = array<i64: 8, 32>}, {transform_indices = @transform_1, window_bounds = array<i64: 8, 1>}, {transform_indices = @transform_2, window_bounds = array<i64: 8, 1>}]} {
    %c0_i32 = arith.constant 0 : i32
    %0 = arith.cmpi eq, %arg1, %c0_i32 : i32
    %1 = arith.extui %0 : i1 to i32
    %c0_i32_0 = arith.constant 0 : i32
    %2 = arith.cmpi ne, %1, %c0_i32_0 : i32
    scf.if %2 {
      %cst_21 = arith.constant -1.000000e+30 : f32
      %37 = vector.broadcast %cst_21 : f32 to vector<8x1xf32>
      %c0_22 = arith.constant 0 : index
      %c0_23 = arith.constant 0 : index
      %38 = vector.load %arg5[%c0_22, %c0_23] : memref<8x1xf32, #tpu.memory_space<vmem>>, vector<8x1xf32>
      tpu.vector_store %arg5[%c0_22, %c0_23], %37 {strides = array<i32>} : memref<8x1xf32, #tpu.memory_space<vmem>>, vector<8x1xf32>,
      %cst_24 = arith.constant 0.000000e+00 : f32
      %39 = vector.broadcast %cst_24 : f32 to vector<8x1xf32>
      %c0_25 = arith.constant 0 : index
      %c0_26 = arith.constant 0 : index
      %40 = vector.load %arg6[%c0_25, %c0_26] : memref<8x1xf32, #tpu.memory_space<vmem>>, vector<8x1xf32>
      tpu.vector_store %arg6[%c0_25, %c0_26], %39 {strides = array<i32>} : memref<8x1xf32, #tpu.memory_space<vmem>>, vector<8x1xf32>,
      %cst_27 = arith.constant 0.000000e+00 : f32
      %41 = vector.broadcast %cst_27 : f32 to vector<8x1xf32>
      %c0_28 = arith.constant 0 : index
      %c0_29 = arith.constant 0 : index
      %42 = vector.load %arg7[%c0_28, %c0_29] : memref<8x1xf32, #tpu.memory_space<vmem>>, vector<8x1xf32>
      tpu.vector_store %arg7[%c0_28, %c0_29], %41 {strides = array<i32>} : memref<8x1xf32, #tpu.memory_space<vmem>>, vector<8x1xf32>,
    } else {
    }
    %c0 = arith.constant 0 : index
    %c0_1 = arith.constant 0 : index
    %3 = vector.load %arg2[%c0, %c0_1] : memref<8x32xf32, #tpu.memory_space<vmem>>, vector<8x32xf32>
    %c0_2 = arith.constant 0 : index
    %c0_3 = arith.constant 0 : index
    %4 = vector.load %arg3[%c0_2, %c0_3] : memref<8x1xi32, #tpu.memory_space<vmem>>, vector<8x1xi32>
    %5 = tpu.iota {dimensions = array<i32: 1>} : vector<8x32xi32>
    %c32_i32 = arith.constant 32 : i32
    %6 = arith.muli %arg1, %c32_i32 : i32
    %7 = vector.broadcast %6 : i32 to vector<8x32xi32>
    %8 = arith.addi %5, %7 : vector<8x32xi32>
    %9 = vector.broadcast %4 : vector<8x1xi32> to vector<8x32xi32>
    %10 = arith.cmpi eq, %8, %9 : vector<8x32xi32>
    %c0_4 = arith.constant 0 : index
    %c0_5 = arith.constant 0 : index
    %11 = vector.load %arg7[%c0_4, %c0_5] : memref<8x1xf32, #tpu.memory_space<vmem>>, vector<8x1xf32>
    %cst = arith.constant 0.000000e+00 : f32
    %12 = vector.broadcast %cst : f32 to vector<8x32xf32>
    %13 = arith.select %10, %3, %12 : vector<8x32xi1>, vector<8x32xf32>
    %cst_6 = arith.constant dense<0.000000e+00> : vector<8xf32>
    %14 = vector.multi_reduction <add>, %13, %cst_6 [1] : vector<8x32xf32> to vector<8xf32>
    %15 = vector.shape_cast %14 : vector<8xf32> to vector<8x1xf32>
    %16 = arith.addf %11, %15 : vector<8x1xf32>
    %c0_7 = arith.constant 0 : index
    %c0_8 = arith.constant 0 : index
    %17 = vector.load %arg7[%c0_7, %c0_8] : memref<8x1xf32, #tpu.memory_space<vmem>>, vector<8x1xf32>
    tpu.vector_store %arg7[%c0_7, %c0_8], %16 {strides = array<i32>} : memref<8x1xf32, #tpu.memory_space<vmem>>, vector<8x1xf32>,
    %c0_9 = arith.constant 0 : index
    %c0_10 = arith.constant 0 : index
    %18 = vector.load %arg5[%c0_9, %c0_10] : memref<8x1xf32, #tpu.memory_space<vmem>>, vector<8x1xf32>
    %cst_11 = arith.constant dense<0xFF800000> : vector<8xf32>
    %19 = vector.multi_reduction <maximumf>, %3, %cst_11 [1] : vector<8x32xf32> to vector<8xf32>
    %20 = vector.shape_cast %19 : vector<8xf32> to vector<8x1xf32>
    %21 = arith.maximumf %18, %20 : vector<8x1xf32>
    %c0_12 = arith.constant 0 : index
    %c0_13 = arith.constant 0 : index
    %22 = vector.load %arg6[%c0_12, %c0_13] : memref<8x1xf32, #tpu.memory_space<vmem>>, vector<8x1xf32>
    %23 = arith.subf %18, %21 : vector<8x1xf32>
    %24 = math.exp %23 : vector<8x1xf32>
    %25 = arith.mulf %22, %24 : vector<8x1xf32>
    %26 = vector.broadcast %21 : vector<8x1xf32> to vector<8x32xf32>
    %27 = arith.subf %3, %26 : vector<8x32xf32>
    %28 = math.exp %27 : vector<8x32xf32>
    %cst_14 = arith.constant dense<0.000000e+00> : vector<8xf32>
    %29 = vector.multi_reduction <add>, %28, %cst_14 [1] : vector<8x32xf32> to vector<8xf32>
    %30 = vector.shape_cast %29 : vector<8xf32> to vector<8x1xf32>
    %31 = arith.addf %25, %30 : vector<8x1xf32>
    %c0_15 = arith.constant 0 : index
    %c0_16 = arith.constant 0 : index
    %32 = vector.load %arg6[%c0_15, %c0_16] : memref<8x1xf32, #tpu.memory_space<vmem>>, vector<8x1xf32>
    tpu.vector_store %arg6[%c0_15, %c0_16], %31 {strides = array<i32>} : memref<8x1xf32, #tpu.memory_space<vmem>>, vector<8x1xf32>,
    %c0_17 = arith.constant 0 : index
    %c0_18 = arith.constant 0 : index
    %33 = vector.load %arg5[%c0_17, %c0_18] : memref<8x1xf32, #tpu.memory_space<vmem>>, vector<8x1xf32>
    tpu.vector_store %arg5[%c0_17, %c0_18], %21 {strides = array<i32>} : memref<8x1xf32, #tpu.memory_space<vmem>>, vector<8x1xf32>,
    %c0_i32_19 = arith.constant 0 : i32
    %34 = arith.cmpi eq, %arg1, %c0_i32_19 : i32
    %35 = arith.extui %34 : i1 to i32
    %c0_i32_20 = arith.constant 0 : i32
    %36 = arith.cmpi ne, %35, %c0_i32_20 : i32
    scf.if %36 {
      %c0_21 = arith.constant 0 : index
      %c0_22 = arith.constant 0 : index
      %37 = vector.load %arg5[%c0_21, %c0_22] : memref<8x1xf32, #tpu.memory_space<vmem>>, vector<8x1xf32>
      %c0_23 = arith.constant 0 : index
      %c0_24 = arith.constant 0 : index
      %38 = vector.load %arg7[%c0_23, %c0_24] : memref<8x1xf32, #tpu.memory_space<vmem>>, vector<8x1xf32>
      %39 = arith.subf %37, %38 : vector<8x1xf32>
      %c0_25 = arith.constant 0 : index
      %c0_26 = arith.constant 0 : index
      %40 = vector.load %arg6[%c0_25, %c0_26] : memref<8x1xf32, #tpu.memory_space<vmem>>, vector<8x1xf32>
      %41 = math.log %40 : vector<8x1xf32>
      %42 = arith.addf %39, %41 : vector<8x1xf32>
      %cst_27 = arith.constant 0.000000e+00 : f32
      %43 = vector.broadcast %cst_27 : f32 to vector<8x1xf32>
      %44 = arith.subf %43, %42 : vector<8x1xf32>
      %45 = math.exp %44 : vector<8x1xf32>
      %cst_28 = arith.constant 1.000000e+00 : f32
      %46 = vector.broadcast %cst_28 : f32 to vector<8x1xf32>
      %47 = arith.subf %46, %45 : vector<8x1xf32>
      %cst_29 = arith.constant 1.000000e+00 : f32
      %48 = vector.broadcast %cst_29 : f32 to vector<8x1xf32>
      %49 = arith.mulf %48, %47 : vector<8x1xf32>
      %50 = arith.mulf %49, %47 : vector<8x1xf32>
      %51 = arith.mulf %50, %42 : vector<8x1xf32>
      %c0_30 = arith.constant 0 : index
      %c0_31 = arith.constant 0 : index
      %52 = vector.load %arg4[%c0_30, %c0_31] : memref<8x1xf32, #tpu.memory_space<vmem>>, vector<8x1xf32>
      tpu.vector_store %arg4[%c0_30, %c0_31], %51 {strides = array<i32>} : memref<8x1xf32, #tpu.memory_space<vmem>>, vector<8x1xf32>,
    } else {
    }
    return
  }
  func.func @transform_0(%arg0: i32, %arg1: i32) -> (i32, i32) {
    %c0_i32 = arith.constant 0 : i32
    return %arg0, %arg1 : i32, i32
  }
  func.func @transform_1(%arg0: i32, %arg1: i32) -> (i32, i32) {
    %c0_i32 = arith.constant 0 : i32
    %c0_i32_0 = arith.constant 0 : i32
    return %arg0, %c0_i32 : i32, i32
  }
  func.func @transform_2(%arg0: i32, %arg1: i32) -> (i32, i32) {
    %c0_i32 = arith.constant 0 : i32
    %c0_i32_0 = arith.constant 0 : i32
    return %arg0, %c0_i32 : i32, i32
  }
}

</mosaic_0001>

<bundles_post_ra>
// kernel: tpu_custom_call.1
= control target key start
LH: loop header
LB: loop body
LE: loop exit
PB: predicated region body
PF: predicated region fallthrough
CT: control target
= control target key end

     0   :  { %vm32_vm0 = vcmask 261120   ;;  %v97_v0 = vmov 0   ;;  %vm15_vm1 = vcmask 7168   ;;  %v98_v4 = vmov -1e+30   ;;  %s134_s1 = inlined_call_operand.vmem [shape: s32[8,1], index: 1, kind: input, shape index: {}]   ;;  %s135_s0 = inlined_call_operand.vmem [shape: f32[8,32], index: 0, kind: input, shape index: {}]   ;;  %s136_s2 = inlined_call_operand.vmem [shape: f32[8,1], index: 2, kind: output, shape index: {}]  }
   0x1   :  { %88 = vset.pattern.permute.xlu1 %v97_v0  ;;  %v20_v1 = vld [vmem:[%s134_s1] sm:$0xff]  ;;  %87 = vset.pattern.permute.xlu0 %v97_v0  ;;  %16 = vst.msk [vmem:[#allocation2] sm:$0xff] %vm15_vm1, %v98_v4  ;;  %v99_v5 = vmov 0.0   ;;  %v21_v6 = vlaneseq }
   0x2   :  { %v19_v2 = vld [vmem:[%s135_s0] sm:$0xff]  ;;  %27 = vperm.xlu1 %88, %v20_v1   ;;  %18 = vst.msk [vmem:[#allocation4] sm:$0xff] %vm15_vm1, %v99_v5 }
   0x3   :  { %v40_v3 = vsel %vm32_vm0, %v19_v2, -inf  ;;  %17 = vst.msk [vmem:[#allocation3] sm:$0xff] %vm15_vm1, %v99_v5  ;;  %v22_v7 = vand.u32 127, %v21_v6 }
   0x4   :  { %41 = vmax.xlane.f32.xlu0 %v40_v3 }
   0x8   :  { %v39_v9 = vld [vmem:[#allocation2] sm:$0xff] }
   0x9   :  { %v30_v15 = vld [vmem:[#allocation4] sm:$0xff] }
   0xa   :  { %v44_v25 = vld [vmem:[#allocation3] sm:$0xff] }
  0x74   :  { %v28_v8 = vpop.permute.xlu1 %27 }
  0x75   :  { %vm29_vm2 = vcmp.eq.s32.totalorder %v22_v7, %v28_v8 }
  0x76   :  { %v31_v11 = vsel %vm29_vm2, %v19_v2, 0.0 }
  0x77   :  { %v42_v10 = vpop.xlane.xlu0 %41  ;;  %v33_v13 = vsel %vm32_vm0, %v31_v11, 0.0 }
  0x78   :  { %v43_v12 = vmax.f32 %v39_v9, %v42_v10  ;;  %34 = vadd.xlane.f32.xlu2 %v33_v13 }
  0x7a   :  { %v45_v14 = vsub.f32 %v39_v9, %v43_v12  ;;  %62 = vst.msk [vmem:[#allocation2] sm:$0xff] %vm15_vm1, %v43_v12  ;;  %51 = vperm.xlu0 %87, %v43_v12  }
  0x7c   :  { %v46_v23 = vmul.f32 1.442695, %v45_v14 }
  0x81   :  { %v66_v32 = vld [vmem:[#allocation2] sm:$0xff] }
  0xeb   :  { %v35_v17 = vpop.xlane.xlu2 %34 }
  0xec   :  { %v52_v16 = vpop.permute.xlu0 %51  ;;  %v36_v19 = vadd.f32 %v35_v17, %v30_v15 }
  0xed   :  { %v54_v18 = vsub.f32 %v19_v2, %v52_v16 }
  0xee   :  { %38 = vst.msk [vmem:[#allocation4] sm:$0xff] %vm15_vm1, %v36_v19 }
  0xef   :  { %v55_v20 = vmul.f32 1.442695, %v54_v18 }
  0xf1   :  { %89 = vpow2.f32 %v55_v20 }
  0xf2   :  { %91 = vpow2.f32 %v46_v23 }
  0xf5   :  { %v67_v30 = vld [vmem:[#allocation4] sm:$0xff] }
  0xf6   :  { %v68_v33 = vsub.f32 %v66_v32, %v67_v30 }
  0xf7   :  { %v90_v21 = vpop.eup %89 }
  0xf8   :  { %v57_v22 = vsel %vm32_vm0, %v90_v21, 0.0  ;;  %v92_v24 = vpop.eup %91 }
  0xf9   :  { %58 = vadd.xlane.f32.xlu1 %v57_v22  ;;  %v48_v26 = vmul.f32 %v92_v24, %v44_v25 }
 0x16c   :  { %v59_v27 = vpop.xlane.xlu1 %58 }
 0x16d   :  { %v60_v28 = vadd.f32 %v59_v27, %v48_v26 }
 0x16f   :  { %61 = vst.msk [vmem:[#allocation3] sm:$0xff] %vm15_vm1, %v60_v28 }
 0x176   :  { %v69_v29 = vld [vmem:[#allocation3] sm:$0xff] }
 0x177   :  { %93 = vlog2.f32 %v69_v29 }
 0x17d   :  { %v94_v31 = vpop.eup %93 }
 0x17e   :  { %v71_v34 = vmul.f32 0.6931472, %v94_v31 }
 0x180   :  { %v72_v35 = vadd.f32 %v71_v34, %v68_v33 }
 0x182   :  { %v73_v36 = vsub.f32 0.0, %v72_v35 }
 0x184   :  { %v74_v37 = vmul.f32 1.442695, %v73_v36 }
 0x186   :  { %95 = vpow2.f32 %v74_v37 }
 0x18c   :  { %v96_v38 = vpop.eup %95 }
 0x18d   :  { %v76_v39 = vsub.f32 1.0, %v96_v38 }
 0x18f   :  { %v77_v40 = vmul.f32 %v76_v39, %v76_v39 }
 0x191   :  { %v78_v41 = vmul.f32 %v77_v40, %v72_v35 }
 0x193   :  { %79 = vst.msk [vmem:[%s136_s2] sm:$0xff] %vm15_vm1, %v78_v41 }

</bundles_post_ra>
